<compile_context>
chip_gen: v6e
topology: v6e:2x2x1
jax: 0.10.0
libtpu: 0.0.40
codegen_flags: <defaults>
</compile_context>

<pallas_src>
import functools
import math

import numpy as np
import jax
import jax.numpy as jnp
from jax.experimental import pallas as pl
from jax.experimental.pallas import tpu as pltpu

N_QUBIT = 4
N_LAYER = 2
N_OUT = 2


# ----------------------------- Pallas kernel ---------------------------------
def qlayer_kernel(xcs_ref, gsel_ref, gblk_ref, msel_ref, out_ref, *, nq):
    """Lane-packed batched statevector circuit (PACK samples per 128-lane row).

    xcs_ref:  (TR, 2*PACK*nq)       f32 -- [x | x - pi/2] per packed sample
    gsel_ref: (nq, 2*PACK*nq, 128)  f32 -- per-qubit cos/sin -> basis-lane selectors
    gblk_ref: (128, 128)            f32 -- block-diag(PACK x G^T), G = composed circuit
    msel_ref: (128, PACK*nout)      f32 -- 0/1 measurement-marginal selector
    out_ref:  (TR, PACK*nout)       f32 -- packed P(qubit==0) per sample/output
    """
    cs = jnp.cos(xcs_ref[...])                                   # EUP, one pass
    # encoder state: per-qubit lane expansion via tiny MXU matmuls, product on the VPU
    state = jnp.dot(cs, gsel_ref[0], preferred_element_type=jnp.float32)
    for i in range(1, nq):                                       # static unroll (nq small)
        state = state * jnp.dot(cs, gsel_ref[i],
                                preferred_element_type=jnp.float32)
    # whole parameterised circuit: one full-width MXU matmul
    psi = jnp.dot(state, gblk_ref[...], preferred_element_type=jnp.float32)
    psi2 = psi * psi                                             # real amplitudes (RY+CX only)
    # measurement marginals: one more MXU matmul, written packed & exact-size
    out_ref[...] = jnp.dot(psi2, msel_ref[...],
                           preferred_element_type=jnp.float32)


# ------------------------- gate composition glue (plain JAX) -----------------
def _ry_2x2(theta):
    c = jnp.cos(theta / 2.0)
    s = jnp.sin(theta / 2.0)
    return jnp.stack([jnp.stack([c, -s]), jnp.stack([s, c])])


def _ry_layer(angles, nq):
    # RY(angles[q]) on qubit q; Qiskit little-endian => full op = G_{nq-1} (x) ... (x) G_0
    u = _ry_2x2(angles[nq - 1])
    for q in range(nq - 2, -1, -1):
        u = jnp.kron(u, _ry_2x2(angles[q]))
    return u


def _cx_chain(nq):
    # CX(0,1), CX(1,2), ..., CX(nq-2, nq-1) composed into one permutation matrix.
    d = 2 ** nq
    perm = np.zeros((d, d), np.float32)
    for j in range(d):
        jj = j
        for c in range(nq - 1):
            if (jj >> c) & 1:
                jj ^= 1 << (c + 1)
        perm[jj, j] = 1.0
    return jnp.asarray(perm)


def _build_gsel(nq, pack):
    # Gsel[i] maps [cos-lanes | sin-lanes] (width 2*pack*nq) to the 128 basis lanes:
    # lane p*D+st picks cos(x_i) if bit_i(st)==0 else sin(x_i) of packed sample p.
    d = 2 ** nq
    width = 2 * pack * nq
    gsel = np.zeros((nq, width, pack * d), np.float32)
    for i in range(nq):
        for p in range(pack):
            for st in range(d):
                bit = (st >> i) & 1
                lane = p * d + st
                gsel[i, p * nq + i, lane] = 1.0 - bit
                gsel[i, pack * nq + p * nq + i, lane] = float(bit)
    return jnp.asarray(gsel)


def _build_msel(nq, nout, pack):
    # column p*nout+cc = mask of basis states of packed sample p with bit q_cc == 0,
    # q_cc = nq - nout + cc  (matches qc.measure(q[-nout + cc], c))
    d = 2 ** nq
    m = np.zeros((pack * d, pack * nout), np.float32)
    for p in range(pack):
        for cc in range(nout):
            q = nq - nout + cc
            for st in range(d):
                if ((st >> q) & 1) == 0:
                    m[p * d + st, p * nout + cc] = 1.0
    return jnp.asarray(m)


def _round_up(n, m):
    return ((n + m - 1) // m) * m


@functools.partial(jax.jit, static_argnames=("nq", "nl", "nout", "block_b"))
def qlayer_forward(x, alfa, *, nq=N_QUBIT, nl=N_LAYER, nout=N_OUT, block_b=2048):
    """Batched Qlayer forward: x (..., nq) -> (B, nout) exact probabilities (f32)."""
    x = x.reshape(-1, nq).astype(jnp.float32)
    b = x.shape[0]
    theta = alfa.reshape(nl, nq).astype(jnp.float32)
    d = 2 ** nq
    pack = 128 // d                     # samples per 128-lane row (8 for nq=4)
    lanes = pack * d                    # = 128

    # Fold the whole post-encoder circuit into one (D, D) matrix, then block-diag it.
    cx = _cx_chain(nq)
    g = jnp.eye(d, dtype=jnp.float32)
    for l in range(nl):
        g = cx @ (_ry_layer(theta[l], nq) @ g)
    gblk = jnp.kron(jnp.eye(pack, dtype=jnp.float32), g.T)       # (128, 128) block-diag

    gsel = _build_gsel(nq, pack)                                 # (nq, 2*pack*nq, 128)
    msel = _build_msel(nq, nout, pack)                           # (128, pack*nout)

    # --- batch tiling: TR rows (= TR*pack samples) per grid step ------------
    r_min = -(-b // pack)                                        # rows needed
    tr_target = _round_up(max(block_b // pack, 8), 8)
    if r_min >= 16:
        # always allow >= 2 grid tiles so v7x can shard across its 2 TensorCores
        tr = min(tr_target, _round_up((r_min + 1) // 2, 8))
    else:
        tr = min(_round_up(max(r_min, 1), 8), tr_target)
    tr = max(tr, 8)
    r_pad = _round_up(r_min, tr)
    b_pad = r_pad * pack

    if b_pad != b:
        x = jnp.pad(x, ((0, b_pad - b), (0, 0)))
    xp = x.reshape(r_pad, pack * nq)
    # [x | x - pi/2]: a single in-kernel cos() yields both cos(x) and sin(x) lanes.
    xcs = jnp.concatenate([xp, xp - (math.pi / 2.0)], axis=-1)   # (r_pad, 2*pack*nq)

    out = pl.pallas_call(
        functools.partial(qlayer_kernel, nq=nq),
        out_shape=jax.ShapeDtypeStruct((r_pad, pack * nout), jnp.float32),
        grid_spec=pltpu.PrefetchScalarGridSpec(
            num_scalar_prefetch=0,
            grid=(r_pad // tr,),
            in_specs=[
                pl.BlockSpec((tr, 2 * pack * nq), lambda i: (i, 0)),      # per-sample data
                pl.BlockSpec((nq, 2 * pack * nq, lanes), lambda i: (0, 0, 0)),  # resident
                pl.BlockSpec((lanes, lanes), lambda i: (0, 0)),           # resident
                pl.BlockSpec((lanes, pack * nout), lambda i: (0, 0)),     # resident
            ],
            out_specs=pl.BlockSpec((tr, pack * nout), lambda i: (i, 0)),  # packed output
        ),
        compiler_params=pltpu.CompilerParams(
            dimension_semantics=("parallel",)),                  # 2-TC sharding on v7x
    )(xcs, gsel, gblk, msel)

    out = out.reshape(b_pad, nout)                               # unpack 8 samples/row
    return out[:b]


# --------------------- independent numpy reference (for checking) ------------
def _ref_forward(x, theta, nq, nl, nout):
    psi = np.zeros(2 ** nq, np.float64)
    psi[0] = 1.0

    def apply_ry(psi, q, ang):
        c, s = np.cos(ang / 2.0), np.sin(ang / 2.0)
        new = psi.copy()
        for j in range(2 ** nq):
            if ((j >> q) & 1) == 0:
                j1 = j | (1 << q)
                a0, a1 = psi[j], psi[j1]
                new[j] = c * a0 - s * a1
                new[j1] = s * a0 + c * a1
        return new

    def apply_cx(psi, ctrl, tgt):
        new = psi.copy()
        for j in range(2 ** nq):
            if (j >> ctrl) & 1:
                new[j ^ (1 << tgt)] = psi[j]
        return new

    for i in range(nq):
        psi = apply_ry(psi, i, 2.0 * x[i])
    for l in range(nl):
        for j in range(nq):
            psi = apply_ry(psi, j, theta[l * nq + j])
        for j in range(nq - 1):
            psi = apply_cx(psi, j, j + 1)

    out = np.zeros((1, nout), np.float32)
    for cc in range(nout):
        q = nq - nout + cc
        out[0, cc] = sum(psi[j] ** 2 for j in range(2 ** nq) if ((j >> q) & 1) == 0)
    return out


if __name__ == "__main__":
    key = jax.random.PRNGKey(0)
    kx, ka = jax.random.split(key)

    B = 256  # batch of independent samples (each row == one original Qlayer forward)
    x = jax.random.uniform(kx, (B, N_QUBIT), jnp.float32, minval=-1.0, maxval=1.0)
    # self.alfa = Parameter uniform(-pi, pi) of shape (n_qubit * n_layer,), deterministic here
    alfa = jax.random.uniform(
        ka, (N_QUBIT * N_LAYER,), jnp.float32, minval=-math.pi, maxval=math.pi
    )

    # small-tile path (grid of 2 "parallel" batch tiles) and default-tile path
    out = jax.block_until_ready(qlayer_forward(x, alfa, block_b=128))
    assert out.shape == (B, N_OUT) and out.dtype == jnp.float32
    out_big = jax.block_until_ready(qlayer_forward(x, alfa))
    assert out_big.shape == (B, N_OUT)

    # single-sample path (== original Qlayer.forward output shape (1, nout))
    out1 = jax.block_until_ready(qlayer_forward(x[0], alfa))
    assert out1.shape == (1, N_OUT) and out1.dtype == jnp.float32

    # independent per-sample numpy reference
    x_np = np.asarray(x, np.float64)
    alfa_np = np.asarray(alfa, np.float64)
    ref = np.concatenate(
        [_ref_forward(x_np[i], alfa_np, N_QUBIT, N_LAYER, N_OUT) for i in range(B)],
        axis=0,
    )
    np.testing.assert_allclose(np.asarray(out), ref, atol=1e-5, rtol=1e-5)
    np.testing.assert_allclose(np.asarray(out_big), ref, atol=1e-5, rtol=1e-5)
    np.testing.assert_allclose(np.asarray(out1), ref[:1], atol=1e-5, rtol=1e-5)
    print("KERNEL_OK")
</pallas_src>

<mosaic_0001>
module attributes {stable_mosaic.version = 11 : i64} {
  func.func @qlayer_kernel(%arg0: i32, %arg1: memref<16x64xf32, #tpu.memory_space<vmem>>, %arg2: memref<4x64x128xf32, #tpu.memory_space<vmem>>, %arg3: memref<128x128xf32, #tpu.memory_space<vmem>>, %arg4: memref<128x16xf32, #tpu.memory_space<vmem>>, %arg5: memref<16x16xf32, #tpu.memory_space<vmem>>) attributes {dimension_semantics = [#tpu.dimension_semantics<parallel>], iteration_bounds = array<i64: 2>, scalar_prefetch = 0 : i64, scratch_operands = 0 : i64, tpu.core_type = #tpu.core_type<tc>, window_params = [{transform_indices = @transform_0, window_bounds = array<i64: 16, 64>}, {pipeline_mode = #tpu.pipeline_mode<synchronous>, transform_indices = @transform_1, window_bounds = array<i64: 4, 64, 128>}, {pipeline_mode = #tpu.pipeline_mode<synchronous>, transform_indices = @transform_2, window_bounds = array<i64: 128, 128>}, {pipeline_mode = #tpu.pipeline_mode<synchronous>, transform_indices = @transform_3, window_bounds = array<i64: 128, 16>}, {transform_indices = @transform_4, window_bounds = array<i64: 16, 16>}]} {
    %c0 = arith.constant 0 : index
    %c0_0 = arith.constant 0 : index
    %0 = vector.load %arg1[%c0, %c0_0] : memref<16x64xf32, #tpu.memory_space<vmem>>, vector<16x64xf32>
    %1 = math.cos %0 : vector<16x64xf32>
    %c0_1 = arith.constant 0 : index
    %c0_2 = arith.constant 0 : index
    %c0_3 = arith.constant 0 : index
    %2 = vector.load %arg2[%c0_1, %c0_2, %c0_3] : memref<4x64x128xf32, #tpu.memory_space<vmem>>, vector<1x64x128xf32>
    %3 = vector.shape_cast %2 : vector<1x64x128xf32> to vector<64x128xf32>
    %cst = arith.constant dense<0.000000e+00> : vector<16x128xf32>
    %4 = tpu.matmul %1, %3, %cst {dimension_numbers = #tpu.dot_dimension_numbers<[1], [0], [0], [1], [0, 0, 1, 1], [], []>} : vector<16x64xf32>, vector<64x128xf32>, vector<16x128xf32> -> vector<16x128xf32>
    %c1 = arith.constant 1 : index
    %c0_4 = arith.constant 0 : index
    %c0_5 = arith.constant 0 : index
    %5 = vector.load %arg2[%c1, %c0_4, %c0_5] : memref<4x64x128xf32, #tpu.memory_space<vmem>>, vector<1x64x128xf32>
    %6 = vector.shape_cast %5 : vector<1x64x128xf32> to vector<64x128xf32>
    %cst_6 = arith.constant dense<0.000000e+00> : vector<16x128xf32>
    %7 = tpu.matmul %1, %6, %cst_6 {dimension_numbers = #tpu.dot_dimension_numbers<[1], [0], [0], [1], [0, 0, 1, 1], [], []>} : vector<16x64xf32>, vector<64x128xf32>, vector<16x128xf32> -> vector<16x128xf32>
    %8 = arith.mulf %4, %7 : vector<16x128xf32>
    %c2 = arith.constant 2 : index
    %c0_7 = arith.constant 0 : index
    %c0_8 = arith.constant 0 : index
    %9 = vector.load %arg2[%c2, %c0_7, %c0_8] : memref<4x64x128xf32, #tpu.memory_space<vmem>>, vector<1x64x128xf32>
    %10 = vector.shape_cast %9 : vector<1x64x128xf32> to vector<64x128xf32>
    %cst_9 = arith.constant dense<0.000000e+00> : vector<16x128xf32>
    %11 = tpu.matmul %1, %10, %cst_9 {dimension_numbers = #tpu.dot_dimension_numbers<[1], [0], [0], [1], [0, 0, 1, 1], [], []>} : vector<16x64xf32>, vector<64x128xf32>, vector<16x128xf32> -> vector<16x128xf32>
    %12 = arith.mulf %8, %11 : vector<16x128xf32>
    %c3 = arith.constant 3 : index
    %c0_10 = arith.constant 0 : index
    %c0_11 = arith.constant 0 : index
    %13 = vector.load %arg2[%c3, %c0_10, %c0_11] : memref<4x64x128xf32, #tpu.memory_space<vmem>>, vector<1x64x128xf32>
    %14 = vector.shape_cast %13 : vector<1x64x128xf32> to vector<64x128xf32>
    %cst_12 = arith.constant dense<0.000000e+00> : vector<16x128xf32>
    %15 = tpu.matmul %1, %14, %cst_12 {dimension_numbers = #tpu.dot_dimension_numbers<[1], [0], [0], [1], [0, 0, 1, 1], [], []>} : vector<16x64xf32>, vector<64x128xf32>, vector<16x128xf32> -> vector<16x128xf32>
    %16 = arith.mulf %12, %15 : vector<16x128xf32>
    %c0_13 = arith.constant 0 : index
    %c0_14 = arith.constant 0 : index
    %17 = vector.load %arg3[%c0_13, %c0_14] : memref<128x128xf32, #tpu.memory_space<vmem>>, vector<128x128xf32>
    %cst_15 = arith.constant dense<0.000000e+00> : vector<16x128xf32>
    %18 = tpu.matmul %16, %17, %cst_15 {dimension_numbers = #tpu.dot_dimension_numbers<[1], [0], [0], [1], [0, 0, 1, 1], [], []>} : vector<16x128xf32>, vector<128x128xf32>, vector<16x128xf32> -> vector<16x128xf32>
    %19 = arith.mulf %18, %18 : vector<16x128xf32>
    %c0_16 = arith.constant 0 : index
    %c0_17 = arith.constant 0 : index
    %20 = vector.load %arg4[%c0_16, %c0_17] : memref<128x16xf32, #tpu.memory_space<vmem>>, vector<128x16xf32>
    %cst_18 = arith.constant dense<0.000000e+00> : vector<16x16xf32>
    %21 = tpu.matmul %19, %20, %cst_18 {dimension_numbers = #tpu.dot_dimension_numbers<[1], [0], [0], [1], [0, 0, 1, 1], [], []>} : vector<16x128xf32>, vector<128x16xf32>, vector<16x16xf32> -> vector<16x16xf32>
    %c0_19 = arith.constant 0 : index
    %c0_20 = arith.constant 0 : index
    %22 = vector.load %arg5[%c0_19, %c0_20] : memref<16x16xf32, #tpu.memory_space<vmem>>, vector<16x16xf32>
    tpu.vector_store %arg5[%c0_19, %c0_20], %21 {strides = array<i32>} : memref<16x16xf32, #tpu.memory_space<vmem>>, vector<16x16xf32>,
    return
  }
  func.func @transform_0(%arg0: i32) -> (i32, i32) {
    %c0_i32 = arith.constant 0 : i32
    %c0_i32_0 = arith.constant 0 : i32
    return %arg0, %c0_i32 : i32, i32
  }
  func.func @transform_1(%arg0: i32) -> (i32, i32, i32) {
    %c0_i32 = arith.constant 0 : i32
    %c0_i32_0 = arith.constant 0 : i32
    %c0_i32_1 = arith.constant 0 : i32
    %c0_i32_2 = arith.constant 0 : i32
    return %c0_i32, %c0_i32_0, %c0_i32_1 : i32, i32, i32
  }
  func.func @transform_2(%arg0: i32) -> (i32, i32) {
    %c0_i32 = arith.constant 0 : i32
    %c0_i32_0 = arith.constant 0 : i32
    %c0_i32_1 = arith.constant 0 : i32
    return %c0_i32, %c0_i32_0 : i32, i32
  }
  func.func @transform_3(%arg0: i32) -> (i32, i32) {
    %c0_i32 = arith.constant 0 : i32
    %c0_i32_0 = arith.constant 0 : i32
    %c0_i32_1 = arith.constant 0 : i32
    return %c0_i32, %c0_i32_0 : i32, i32
  }
  func.func @transform_4(%arg0: i32) -> (i32, i32) {
    %c0_i32 = arith.constant 0 : i32
    %c0_i32_0 = arith.constant 0 : i32
    return %arg0, %c0_i32 : i32, i32
  }
}

</mosaic_0001>

<bundles_post_ra>
// kernel: qlayer_forward.1
= control target key start
LH: loop header
LB: loop body
LE: loop exit
PB: predicated region body
PF: predicated region fallthrough
CT: control target
= control target key end

     0   :  { %s1342_s15 = smov 0   ;;  %s1666_s0 = inlined_call_operand.vmem [shape: f32[32,64], index: 0, kind: input, shape index: {}]   ;;  %s1667_s1 = inlined_call_operand.vmem [shape: f32[4,64,128], index: 1, kind: input, shape index: {}]   ;;  %s1668_s2 = inlined_call_operand.vmem [shape: f32[128,128], index: 2, kind: input, shape index: {}]   ;;  %s1669_s3 = inlined_call_operand.vmem [shape: f32[128,16], index: 3, kind: input, shape index: {}]   ;;  %s1670_s4 = inlined_call_operand.vmem [shape: f32[32,16], index: 4, kind: output, shape index: {}]  }
   0x1 LB: > { %s1000_s16 = sadd.s32 4294967295, %s1309_s15   ;;  %p1004_p0 = scmp.ge.s32.totalorder %s1309_s15, 1  ;;  %s1309_s15 = sphi %s1342_s15, %s14_s15  }
   0x2   : > { %p163_p1 = scmp.lt.s32.totalorder %s1309_s15, 3 }
   0x4   : > { %p164_p2 = pnand %p1004_p0, %p163_p1 }
   0x5   : > { %s1005_s23 = sshll.u32 (!%p164_p2), %s1000_s16, 1 }
   0x6   : > { %167 = sbr.rel (%p164_p2) target bundleno = 718 (0x2ce), region = 36  ;;  %p190_p3 = scmp.lt.s32.totalorder (!%p164_p2), %s1005_s23, 3 }
   0xb   : > { %v416_v0 = vld [vmem:[%s1667_s1 + $0x38] sm:$0xff]  ;;  %v415_v2 = vld [vmem:[%s1667_s1 + $0x30] sm:$0xff]  ;;  %v414_v4 = vld [vmem:[%s1667_s1 + $0x28] sm:$0xff]  ;;  %s1676_s23 = smov (!%p190_p3, %s1005_s23), 3  ;;  %v1311_v42 = vmov 683565275  }
   0xc   : > { %v1026_v1 = vld [vmem:[%s1667_s1 + $0x78] sm:$0xff]  ;;  %1127 = vmatprep.subr.mxu0 %v416_v0  ;;  %v1025_v3 = vld [vmem:[%s1667_s1 + $0x70] sm:$0xff]  ;;  %v1024_v5 = vld [vmem:[%s1667_s1 + $0x68] sm:$0xff]  ;;  %s1006_s8 = sshll.u32 %s1676_s23, 3  ;;  %v1312_v44 = vmov 2475754826  }
   0xd   : > { %1146 = vmatprep.subr.mxu1 %v1026_v1  ;;  %1128 = vmatpush3.msra.mxu0 %v416_v0  ;;  %v413_v6 = vld [vmem:[%s1667_s1 + $0x20] sm:$0xff]  ;;  %v412_v8 = vld [vmem:[%s1667_s1 + $0x18] sm:$0xff]  ;;  %s193_s16 = scalar_lea.vmem %s1666_s0, %s1006_s8  ;;  %v411_v12 = vld [vmem:[%s1667_s1 + $0x10] sm:$0xff]  ;;  %v1313_v46 = vmov 2131351028   ;;  %s199_s11 = scalar_lea.vmem %s1670_s4, %s1006_s8 }
   0xe   : > { %1147 = vmatpush3.msra.mxu1 %v1026_v1  ;;  %1129 = vmatprep.subr.mxu0 %v415_v2  ;;  %v1023_v7 = vld [vmem:[%s1667_s1 + $0x60] sm:$0xff]  ;;  %v1022_v9 = vld [vmem:[%s1667_s1 + $0x58] sm:$0xff]  ;;  %v1390_v11 = vld [vmem:[%s193_s16 + $0x8] sm:$0xff]  ;;  %v1314_v48 = vmov 2102212464  }
   0xf   : > { %1148 = vmatprep.subr.mxu1 %v1025_v3  ;;  %1130 = vmatpush3.msra.mxu0 %v415_v2  ;;  %v1388_v10 = vld [vmem:[%s193_s16] sm:$0xff]  ;;  %v1021_v13 = vld [vmem:[%s1667_s1 + $0x50] sm:$0xff]  ;;  %v306_v16 = vand.u32 2147483647, %v1390_v11  ;;  %v309_v17 = vand.u32 2139095040, %v1390_v11  ;;  %v410_v18 = vld [vmem:[%s1667_s1 + $0x8] sm:$0xff] }
  0x10   : > { %1149 = vmatpush3.msra.mxu1 %v1025_v3  ;;  %1131 = vmatprep.subr.mxu0 %v414_v4  ;;  %v203_v14 = vand.u32 2147483647, %v1388_v10  ;;  %v206_v15 = vand.u32 2139095040, %v1388_v10  ;;  %v1020_v19 = vld [vmem:[%s1667_s1 + $0x48] sm:$0xff]  ;;  %v409_v24 = vld [vmem:[%s1667_s1] sm:$0xff]  ;;  %v1421_v29 = vld [vmem:[%s1667_s1 + $0xb8] sm:$0xff] }
  0x11   : > { %1150 = vmatprep.subr.mxu1 %v1024_v5  ;;  %1132 = vmatpush3.msra.mxu0 %v414_v4  ;;  %v310_v22 = vshrl.u32 %v309_v17, 23  ;;  %v313_v23 = vand.u32 8388607, %v306_v16  ;;  %v1019_v25 = vld [vmem:[%s1667_s1 + $0x40] sm:$0xff]  ;;  %v1426_v30 = vld [vmem:[%s1667_s1 + $0xf8] sm:$0xff]  ;;  %vm205_vm14 = vcmp.lt.s32.totalorder %v1388_v10, 0 }
  0x12   : > { %1151 = vmatpush3.msra.mxu1 %v1024_v5  ;;  %1133 = vmatprep.subr.mxu0 %v413_v6  ;;  %v207_v20 = vshrl.u32 %v206_v15, 23  ;;  %v210_v21 = vand.u32 8388607, %v203_v14  ;;  %v1315_v50 = vmov 920167782  }
  0x13   : > { %1152 = vmatprep.subr.mxu1 %v1023_v7  ;;  %1134 = vmatpush3.msra.mxu0 %v413_v6  ;;  %v1013_v27 = vadd.s32 4294967169, %v310_v22  ;;  %v314_v32 = vor.u32 8388608, %v313_v23  ;;  %v1316_v58 = vmov 1326507024   ;;  %vm1481_vm15 = vcmp.le.f32.partialorder %v203_v14, 0.7853982 }
  0x14   : > { %1153 = vmatpush3.msra.mxu1 %v1023_v7  ;;  %1135 = vmatprep.subr.mxu0 %v412_v8  ;;  %v1009_v26 = vadd.s32 4294967169, %v207_v20  ;;  %v211_v31 = vor.u32 8388608, %v210_v21  ;;  %v857_v14 = vld [vmem:[%s1669_s3 + $0x38] sm:$0xff] }
  0x15   : > { %1154 = vmatprep.subr.mxu1 %v1022_v9  ;;  %1136 = vmatpush3.msra.mxu0 %v412_v8  ;;  %v316_v33 = vadd.s32 1, %v1013_v27  ;;  %v1432_v40 = vshll.u32 %v314_v32, 8 }
  0x16   : > { %1155 = vmatpush3.msra.mxu1 %v1022_v9  ;;  %1137 = vmatprep.subr.mxu0 %v411_v12  ;;  %v213_v28 = vadd.s32 1, %v1009_v26  ;;  %v1430_v38 = vshll.u32 %v211_v31, 8 }
  0x17   : > { %1156 = vmatprep.subr.mxu1 %v1021_v13  ;;  %1138 = vmatpush3.msra.mxu0 %v411_v12  ;;  %vm317_vm1 = vcmp.gt.s32.totalorder %v316_v33, 0 }
  0x18   : > { %1157 = vmatpush3.msra.mxu1 %v1021_v13  ;;  %1139 = vmatprep.subr.mxu0 %v410_v18  ;;  %vm214_vm0 = vcmp.gt.s32.totalorder %v213_v28, 0  ;;  %v318_v37 = vsel %vm317_vm1, %v316_v33, 0  ;;  %vm1491_vm1 = vcmp.le.f32.partialorder %v306_v16, 0.7853982 }
  0x19   : > { %1158 = vmatprep.subr.mxu1 %v1020_v19  ;;  %1140 = vmatpush3.msra.mxu0 %v410_v18  ;;  %v215_v34 = vsel %vm214_vm0, %v213_v28, 0  ;;  %v320_v39 = vand.u32 31, %v318_v37  ;;  %v1434_v52 = vshrl.u32 %v318_v37, 5  ;;  %vm308_vm0 = vcmp.lt.s32.totalorder %v1390_v11, 0 }
  0x1a   : > { %1159 = vmatpush3.msra.mxu1 %v1020_v19  ;;  %1141 = vmatprep.subr.mxu0 %v409_v24  ;;  %v216_v35 = vshrl.u32 %v215_v34, 5  ;;  %v217_v36 = vand.u32 31, %v215_v34 }
  0x1b   : > { %1160 = vmatprep.subr.mxu1 %v1019_v25  ;;  %1142 = vmatpush3.msra.mxu0 %v409_v24  ;;  %v321_v63 = vsub.s32 32, %v320_v39  ;;  %v323_v2 = vshll.u32 %v1311_v42, %v320_v39  ;;  %v326_v12 = vshll.u32 %v1312_v44, %v320_v39  ;;  %v329_v31 = vshll.u32 %v1313_v46, %v320_v39 }
  0x1c   : > { %1161 = vmatpush3.msra.mxu1 %v1019_v25  ;;  %1165 = vmatprep.subr.mxu0 %v1421_v29  ;;  %v218_v41 = vsub.s32 32, %v217_v36  ;;  %v220_v43 = vshll.u32 %v1311_v42, %v217_v36  ;;  %v223_v45 = vshll.u32 %v1312_v44, %v217_v36  ;;  %v226_v47 = vshll.u32 %v1313_v46, %v217_v36 }
  0x1d   : > { %1184 = vmatprep.subr.mxu1 %v1426_v30  ;;  %v229_v49 = vshll.u32 %v1314_v48, %v217_v36  ;;  %v232_v51 = vshll.u32 %v1315_v50, %v217_v36  ;;  %vm235_vm2 = vcmp.lt.s32.totalorder %v216_v35, 1  ;;  %vm236_vm3 = vcmp.lt.s32.totalorder %v216_v35, 2 }
  0x1e   : > { %v219_v53 = vshrl.u32 %v1311_v42, %v218_v41  ;;  %v221_v54 = vshrl.u32 %v1312_v44, %v218_v41  ;;  %v224_v55 = vshrl.u32 %v1313_v46, %v218_v41  ;;  %v227_v56 = vshrl.u32 %v1314_v48, %v218_v41 }
  0x1f   : > { %v230_v57 = vshrl.u32 %v1315_v50, %v218_v41  ;;  %v233_v59 = vshrl.u32 %v1316_v58, %v218_v41  ;;  %vm238_vm4 = vcmp.lt.s32.totalorder %v216_v35, 4  ;;  %vm237_vm5 = vcmp.lt.s32.totalorder %v216_v35, 3 }
  0x20   : > { %v222_v60 = vor.u32 %v221_v54, %v220_v43  ;;  %v225_v61 = vor.u32 %v224_v55, %v223_v45  ;;  %v228_v62 = vor.u32 %v227_v56, %v226_v47  ;;  %v322_v17 = vshrl.u32 %v1311_v42, %v321_v63 }
  0x21   : > { %v231_v0 = vor.u32 %v230_v57, %v229_v49  ;;  %v234_v1 = vor.u32 %v233_v59, %v232_v51  ;;  %v324_v18 = vshrl.u32 %v1312_v44, %v321_v63  ;;  %v327_v22 = vshrl.u32 %v1313_v46, %v321_v63 }
  0x22   : > { %v239_v3 = vsel %vm235_vm2, %v219_v53, %v222_v60  ;;  %v240_v4 = vsel %vm238_vm4, %v228_v62, 2102212464  ;;  %v243_v5 = vsel %vm235_vm2, %v222_v60, %v225_v61  ;;  %v247_v6 = vsel %vm235_vm2, %v225_v61, %v228_v62 }
  0x23   : > { %v241_v7 = vsel %vm237_vm5, %v225_v61, %v240_v4  ;;  %v244_v8 = vsel %vm238_vm4, %v231_v0, 920167782  ;;  %v248_v9 = vsel %vm238_vm4, %v234_v1, 1326507024  ;;  %v325_v27 = vor.u32 %v324_v18, %v323_v2 }
  0x24   : > { %v245_v13 = vsel %vm237_vm5, %v228_v62, %v244_v8  ;;  %v249_v15 = vsel %vm237_vm5, %v231_v0, %v248_v9  ;;  %v242_v19 = vsel %vm236_vm3, %v239_v3, %v241_v7  ;;  %v328_v28 = vor.u32 %v327_v22, %v326_v12 }
  0x25   : > { %v246_v20 = vsel %vm236_vm3, %v243_v5, %v245_v13  ;;  %v250_v21 = vsel %vm236_vm3, %v247_v6, %v249_v15  ;;  %v330_v32 = vshrl.u32 %v1314_v48, %v321_v63  ;;  %v332_v33 = vshll.u32 %v1314_v48, %v320_v39 }
  0x26   : > { %v1443_v23 = vmul.u32.u64.low %v1430_v38, %v250_v21  ;;  %v1444_v24 = vmul.u32.u64.high %v1430_v38, %v250_v21, %v1443_v23  ;;  %v1447_v25 = vmul.u32.u64.low %v1430_v38, %v246_v20  ;;  %v1448_v26 = vmul.u32.u64.high %v1430_v38, %v246_v20, %v1447_v25 }
  0x27   : > { %v333_v34 = vshrl.u32 %v1315_v50, %v321_v63  ;;  %v335_v36 = vshll.u32 %v1315_v50, %v320_v39  ;;  %v336_v37 = vshrl.u32 %v1316_v58, %v321_v63  ;;  %v258_v35 = vmul.u32 %v1430_v38, %v242_v19 }
  0x28   : > { %v331_v41 = vor.u32 %v330_v32, %v329_v31  ;;  %vm338_vm6 = vcmp.lt.s32.totalorder %v1434_v52, 1  ;;  %vm339_vm7 = vcmp.lt.s32.totalorder %v1434_v52, 2  ;;  %vm260_vm8 = vc.u32 %v1444_v24, %v1447_v25 }
  0x29   : > { %v261_v42 = vadd.s32 1, %v1448_v26  ;;  %v334_v43 = vor.u32 %v333_v34, %v332_v33  ;;  %vm340_vm9 = vcmp.lt.s32.totalorder %v1434_v52, 3  ;;  %v337_v44 = vor.u32 %v336_v37, %v335_v36 }
  0x2a   : > { %vm341_vm10 = vcmp.lt.s32.totalorder %v1434_v52, 4  ;;  %v342_v45 = vsel %vm338_vm6, %v322_v17, %v325_v27  ;;  %v346_v39 = vsel %vm338_vm6, %v325_v27, %v328_v28  ;;  %v350_v48 = vsel %vm338_vm6, %v328_v28, %v331_v41 }
  0x2b   : > { %v262_v46 = vsel %vm260_vm8, %v261_v42, %v1448_v26  ;;  %v343_v38 = vsel %vm341_vm10, %v331_v41, 2102212464  ;;  %v347_v47 = vsel %vm341_vm10, %v334_v43, 920167782  ;;  %v351_v53 = vsel %vm341_vm10, %v337_v44, 1326507024 }
  0x2c   : > { %v263_v49 = vadd.s32 %v262_v46, %v258_v35  ;;  %v344_v50 = vsel %vm340_vm9, %v328_v28, %v343_v38  ;;  %v348_v51 = vsel %vm340_vm9, %v331_v41, %v347_v47  ;;  %v352_v56 = vsel %vm340_vm9, %v334_v43, %v351_v53 }
  0x2d   : > { %v345_v54 = vsel %vm339_vm7, %v342_v45, %v344_v50  ;;  %v349_v55 = vsel %vm339_vm7, %v346_v39, %v348_v51  ;;  %v353_v58 = vsel %vm339_vm7, %v350_v48, %v352_v56  ;;  %v259_v17 = vadd.s32 %v1447_v25, %v1444_v24  ;;  %v760_v45 = vld [vmem:[%s1668_s2 + $0x18] sm:$0xff] }
  0x2e   : > { %v264_v57 = vadd.s32 536870912, %v263_v49  ;;  %v1465_v59 = vmul.u32.u64.low %v1432_v40, %v349_v55  ;;  %v1466_v60 = vmul.u32.u64.high %v1432_v40, %v349_v55, %v1465_v59  ;;  %v361_v0 = vmul.u32 %v1432_v40, %v345_v54 }
  0x2f   : > { %v1469_v61 = vmul.u32.u64.low %v1432_v40, %v353_v58  ;;  %v1470_v62 = vmul.u32.u64.high %v1432_v40, %v353_v58, %v1469_v61  ;;  %vm295_vm5 = vweird.f32 %v1388_v10  ;;  %vm417_vm6 = vcmask 523264  }
  0x30   : > { %v265_v63 = vshrl.u32 %v264_v57, 30  ;;  %v364_v2 = vadd.s32 1, %v1466_v60  ;;  %vm398_vm10 = vweird.f32 %v1390_v11 }
  0x31   : > { %vm363_vm11 = vc.u32 %v1470_v62, %v1465_v59  ;;  %v362_v36 = vadd.s32 %v1465_v59, %v1470_v62 }
  0x32   : > { %v266_v1 = vshll.u32 %v265_v63, 30  ;;  %v365_v52 = vsel %vm363_vm11, %v364_v2, %v1466_v60  ;;  %v289_v48 = vsub.s32 4, %v265_v63  ;;  %vm941_vm11 = vcmask 130048  }
  0x33   : > { %v366_v4 = vadd.s32 %v365_v52, %v361_v0 }
  0x34   : > { %v267_v3 = vsub.s32 %v263_v49, %v266_v1  ;;  %v290_v54 = vsel %vm205_vm14, %v289_v48, %v265_v63  ;;  %v864_v48 = vld [vmem:[%s1669_s3 + $0x70] sm:$0xff] }
  0x35   : > { %v367_v6 = vadd.s32 536870912, %v366_v4  ;;  %v292_v57 = vsel %vm1481_vm15, 0, %v290_v54  ;;  %v859_v54 = vld [vmem:[%s1669_s3 + $0x48] sm:$0xff] }
  0x36   : > { %v269_v5 = vsub.s32 0, %v267_v3  ;;  %v296_v61 = vand.u32 3, %v292_v57  ;;  %v855_v57 = vld [vmem:[%s1669_s3 + $0x28] sm:$0xff] }
  0x37   : > { %v368_v8 = vshrl.u32 %v367_v6, 30 }
  0x38   : > { %v1010_v7 = vmin.u32 %v269_v5, %v267_v3  ;;  %vm301_vm2 = vcmp.eq.s32.totalorder %v296_v61, 2  ;;  %vm298_vm3 = vcmp.eq.s32.totalorder %v296_v61, 0  ;;  %vm297_vm4 = vcmp.lt.s32.totalorder %v296_v61, 2 }
  0x39   : > { %v369_v12 = vshll.u32 %v368_v8, 30  ;;  %v392_v59 = vsub.s32 4, %v368_v8 }
  0x3a   : > { %v271_v9 = vclz %v1010_v7 }
  0x3b   : > { %v370_v15 = vsub.s32 %v366_v4, %v369_v12  ;;  %v393_v62 = vsel %vm308_vm0, %v392_v59, %v368_v8  ;;  %v853_v59 = vld [vmem:[%s1669_s3 + $0x18] sm:$0xff] }
  0x3c   : > { %v1011_v13 = vadd.s32 4294967294, %v271_v9  ;;  %v395_v2 = vsel %vm1491_vm1, 0, %v393_v62 }
  0x3d   : > { %v372_v18 = vsub.s32 0, %v370_v15  ;;  %v399_v5 = vand.u32 3, %v395_v2 }
  0x3e   : > { %vm1012_vm12 = vcmp.lt.s32.totalorder %v1011_v13, 0 }
  0x3f   : > { %v274_v40 = vsel %vm1012_vm12, 0, %v1011_v13  ;;  %v1014_v22 = vmin.u32 %v372_v18, %v370_v15  ;;  %vm404_vm7 = vcmp.eq.s32.totalorder %v399_v5, 2  ;;  %vm401_vm8 = vcmp.eq.s32.totalorder %v399_v5, 0  ;;  %v1045_v18 = vld [vmem:[%s1667_s1 + $0xf0] sm:$0xff] }
  0x40   : > { %v275_v19 = vsub.s32 32, %v274_v40  ;;  %v276_v20 = vshll.u32 %v267_v3, %v274_v40  ;;  %v279_v21 = vsub.s32 4294967266, %v274_v40  ;;  %vm400_vm9 = vcmp.lt.s32.totalorder %v399_v5, 2  ;;  %v1035_v40 = vld [vmem:[%s1667_s1 + $0xb0] sm:$0xff] }
  0x41   : > { %v374_v27 = vclz %v1014_v22  ;;  %v1031_v22 = vld [vmem:[%s1667_s1 + $0x90] sm:$0xff] }
  0x42   : > { %v277_v23 = vshrl.u32 %v259_v17, %v275_v19  ;;  %v280_v26 = vadd.s32 127, %v279_v21  ;;  %v1044_v19 = vld [vmem:[%s1667_s1 + $0xe8] sm:$0xff]  ;;  %v1042_v21 = vld [vmem:[%s1667_s1 + $0xd8] sm:$0xff] }
  0x43   : > { %v1015_v32 = vadd.s32 4294967294, %v374_v27  ;;  %v1040_v27 = vld [vmem:[%s1667_s1 + $0xc8] sm:$0xff] }
  0x44   : > { %v278_v28 = vor.u32 %v277_v23, %v276_v20  ;;  %v281_v31 = vshll.u32 %v280_v26, 23  ;;  %v1033_v20 = vld [vmem:[%s1667_s1 + $0xa0] sm:$0xff]  ;;  %v1041_v23 = vld [vmem:[%s1667_s1 + $0xd0] sm:$0xff]  ;;  %v1030_v26 = vld [vmem:[%s1667_s1 + $0x88] sm:$0xff] }
  0x45   : > { %vm1016_vm13 = vcmp.lt.s32.totalorder %v1015_v32, 0 }
  0x46   : > { %v282_v33 = vor.u32 4788187, %v281_v31  ;;  %v285_v34 = vcvt.s32.f32 %v278_v28  ;;  %v377_v24 = vsel %vm1016_vm13, 0, %v1015_v32  ;;  %v1029_v28 = vld [vmem:[%s1667_s1 + $0x80] sm:$0xff]  ;;  %v772_v32 = vld [vmem:[%s1668_s2 + $0x78] sm:$0xff] }
  0x47   : > { %v378_v25 = vsub.s32 32, %v377_v24  ;;  %v379_v35 = vshll.u32 %v370_v15, %v377_v24  ;;  %v382_v41 = vsub.s32 4294967266, %v377_v24  ;;  %v1039_v31 = vld [vmem:[%s1667_s1 + $0xc0] sm:$0xff]  ;;  %v767_v24 = vld [vmem:[%s1668_s2 + $0x50] sm:$0xff] }
  0x48   : > { %v283_v37 = vand.u32 2147483647, %v282_v33  ;;  %v771_v33 = vld [vmem:[%s1668_s2 + $0x70] sm:$0xff] }
  0x49   : > { %v380_v43 = vshrl.u32 %v362_v36, %v378_v25  ;;  %v383_v44 = vadd.s32 127, %v382_v41  ;;  %v769_v36 = vld [vmem:[%s1668_s2 + $0x60] sm:$0xff]  ;;  %v766_v25 = vld [vmem:[%s1668_s2 + $0x48] sm:$0xff]  ;;  %v764_v41 = vld [vmem:[%s1668_s2 + $0x38] sm:$0xff] }
  0x4a   : > { %v286_v42 = vmul.f32 %v285_v34, %v283_v37  ;;  %v770_v34 = vld [vmem:[%s1668_s2 + $0x68] sm:$0xff]  ;;  %v768_v37 = vld [vmem:[%s1668_s2 + $0x58] sm:$0xff] }
  0x4b   : > { %v381_v46 = vor.u32 %v380_v43, %v379_v35  ;;  %v384_v38 = vshll.u32 %v383_v44, 23  ;;  %v765_v35 = vld [vmem:[%s1668_s2 + $0x40] sm:$0xff]  ;;  %v762_v43 = vld [vmem:[%s1668_s2 + $0x28] sm:$0xff] }
  0x4c   : > { %v287_v39 = vxor.u32 2147483648, %v286_v42  ;;  %v761_v44 = vld [vmem:[%s1668_s2 + $0x20] sm:$0xff] }
  0x4d   : > { %v385_v50 = vor.u32 4788187, %v384_v38  ;;  %v388_v51 = vcvt.s32.f32 %v381_v46  ;;  %v758_v46 = vld [vmem:[%s1668_s2 + $0x8] sm:$0xff]  ;;  %v757_v38 = vld [vmem:[%s1668_s2] sm:$0xff] }
  0x4e   : > { %v288_v47 = vsel %vm205_vm14, %v287_v39, %v286_v42  ;;  %v763_v42 = vld [vmem:[%s1668_s2 + $0x30] sm:$0xff] }
  0x4f   : > { %v291_v49 = vsel %vm1481_vm15, %v1388_v10, %v288_v47  ;;  %v386_v53 = vand.u32 2147483647, %v385_v50  ;;  %v759_v39 = vld [vmem:[%s1668_s2 + $0x10] sm:$0xff]  ;;  %v865_v47 = vld [vmem:[%s1669_s3 + $0x78] sm:$0xff]  ;;  %v862_v50 = vld [vmem:[%s1669_s3 + $0x60] sm:$0xff] }
  0x50   : > { %1295 = vcosq.f32 %v291_v49 }
  0x51   : > { %1297 = vsinq.f32 %v291_v49  ;;  %v389_v55 = vmul.f32 %v388_v51, %v386_v53  ;;  %v863_v49 = vld [vmem:[%s1669_s3 + $0x68] sm:$0xff]  ;;  %v861_v51 = vld [vmem:[%s1669_s3 + $0x58] sm:$0xff]  ;;  %v860_v53 = vld [vmem:[%s1669_s3 + $0x50] sm:$0xff] }
  0x53   : > { %v390_v56 = vxor.u32 2147483648, %v389_v55 }
  0x55   : > { %v391_v58 = vsel %vm308_vm0, %v390_v56, %v389_v55  ;;  %v858_v55 = vld [vmem:[%s1669_s3 + $0x40] sm:$0xff]  ;;  %v856_v56 = vld [vmem:[%s1669_s3 + $0x30] sm:$0xff] }
  0x56   : > { %v394_v60 = vsel %vm1491_vm1, %v1390_v11, %v391_v58  ;;  %v1034_v11 = vld [vmem:[%s1667_s1 + $0xa8] sm:$0xff]  ;;  %v854_v58 = vld [vmem:[%s1669_s3 + $0x20] sm:$0xff] }
  0x57   : > { %1299 = vcosq.f32 %v394_v60 }
  0x58   : > { %1301 = vsinq.f32 %v394_v60 }
  0x5d   : > { %v1296_v63 = vpop.eup %1295 }
  0x5e   : > { %v1298_v16 = vpop.eup %1297  ;;  %v302_v0 = vxor.u32 2147483648, %v1296_v63 }
  0x5f   : > { %v299_v1 = vxor.u32 2147483648, %v1298_v16 }
  0x60   : > { %v303_v3 = vsel %vm301_vm2, %v302_v0, %v1298_v16 }
  0x61   : > { %v300_v52 = vsel %vm298_vm3, %v1296_v63, %v299_v1 }
  0x62   : > { %v304_v4 = vsel %vm297_vm4, %v300_v52, %v303_v3 }
  0x63   : > { %v1503_v6 = vsel %vm295_vm5, nan, %v304_v4 }
  0x64   : > { %1143 = vmatprep.mubr.msk.f32.mxu0 %vm417_vm6, %v1503_v6  ;;  %1162 = vmatprep.mubr.msk.f32.mxu1 %vm417_vm6, %v1503_v6  ;;  %v1300_v7 = vpop.eup %1299 }
  0x65   : > { %v1302_v8 = vpop.eup %1301  ;;  %v405_v9 = vxor.u32 2147483648, %v1300_v7 }
  0x66   : > { %v402_v10 = vxor.u32 2147483648, %v1302_v8 }
  0x67   : > { %v406_v12 = vsel %vm404_vm7, %v405_v9, %v1302_v8  ;;  %v852_v8 = vld [vmem:[%s1669_s3 + $0x10] sm:$0xff]  ;;  %v851_v9 = vld [vmem:[%s1669_s3 + $0x8] sm:$0xff] }
  0x68   : > { %v403_v13 = vsel %vm401_vm8, %v1300_v7, %v402_v10  ;;  %v850_v10 = vld [vmem:[%s1669_s3] sm:$0xff] }
  0x69   : > { %v407_v15 = vsel %vm400_vm9, %v403_v13, %v406_v12 }
  0x6a   : > { %v408_v17 = vsel %vm398_vm10, nan, %v407_v15 }
  0x6b   : > { %1144 = vmatmul.mubr.msk.f32.vlgmr.msra.gmra.mxu0 %vm417_vm6, %v408_v17  ;;  %1163 = vmatmul.mubr.msk.f32.vlgmr.msra.gmra.mxu1 %vm417_vm6, %v408_v17 }
  0x6c   : > { %1166 = vmatpush3.msra.mxu0 %v1421_v29  ;;  %1185 = vmatpush3.msra.mxu1 %v1426_v30  ;;  %v1043_v29 = vld [vmem:[%s1667_s1 + $0xe0] sm:$0xff]  ;;  %v1032_v30 = vld [vmem:[%s1667_s1 + $0x98] sm:$0xff] }
  0x6d   : > { %1167 = vmatprep.subr.mxu0 %v1035_v40  ;;  %1186 = vmatprep.subr.mxu1 %v1045_v18 }
  0x6e   : > { %1168 = vmatpush3.msra.mxu0 %v1035_v40  ;;  %1187 = vmatpush3.msra.mxu1 %v1045_v18 }
  0x6f   : > { %1169 = vmatprep.subr.mxu0 %v1034_v11  ;;  %1188 = vmatprep.subr.mxu1 %v1044_v19 }
  0x70   : > { %1170 = vmatpush3.msra.mxu0 %v1034_v11  ;;  %1189 = vmatpush3.msra.mxu1 %v1044_v19 }
  0x71   : > { %1171 = vmatprep.subr.mxu0 %v1033_v20  ;;  %1190 = vmatprep.subr.mxu1 %v1043_v29 }
  0x72   : > { %1172 = vmatpush3.msra.mxu0 %v1033_v20  ;;  %1191 = vmatpush3.msra.mxu1 %v1043_v29 }
  0x73   : > { %1173 = vmatprep.subr.mxu0 %v1032_v30  ;;  %1192 = vmatprep.subr.mxu1 %v1042_v21 }
  0x74   : > { %1174 = vmatpush3.msra.mxu0 %v1032_v30  ;;  %1193 = vmatpush3.msra.mxu1 %v1042_v21 }
  0x75   : > { %1175 = vmatprep.subr.mxu0 %v1031_v22  ;;  %1194 = vmatprep.subr.mxu1 %v1041_v23 }
  0x76   : > { %1176 = vmatpush3.msra.mxu0 %v1031_v22  ;;  %1195 = vmatpush3.msra.mxu1 %v1041_v23 }
  0x77   : > { %1177 = vmatprep.subr.mxu0 %v1030_v26  ;;  %1196 = vmatprep.subr.mxu1 %v1040_v27 }
  0x78   : > { %1178 = vmatpush3.msra.mxu0 %v1030_v26  ;;  %1197 = vmatpush3.msra.mxu1 %v1040_v27 }
  0x79   : > { %1179 = vmatprep.subr.mxu0 %v1029_v28  ;;  %1198 = vmatprep.subr.mxu1 %v1039_v31 }
  0x7a   : > { %1180 = vmatpush3.msra.mxu0 %v1029_v28  ;;  %1181 = vmatprep.mubr.msk.f32.mxu0 %vm417_vm6, %v1503_v6 }
  0x7b   : > { %1199 = vmatpush3.msra.mxu1 %v1039_v31  ;;  %1200 = vmatprep.mubr.msk.f32.mxu1 %vm417_vm6, %v1503_v6 }
  0x7c   : > { %1182 = vmatmul.mubr.msk.f32.vlgmr.msra.gmra.mxu0 %vm417_vm6, %v408_v17  ;;  %1201 = vmatmul.mubr.msk.f32.vlgmr.msra.gmra.mxu1 %vm417_vm6, %v408_v17 }
  0x7d   : > { %1203 = vmatprep.subr.mxu0 %v772_v32  ;;  %1238 = vmatprep.subr.mxu1 %v865_v47 }
  0x7e   : > { %1204 = vmatpush3.msra.mxu0 %v772_v32  ;;  %1239 = vmatpush3.msra.mxu1 %v865_v47 }
  0x7f   : > { %1205 = vmatprep.subr.mxu0 %v771_v33  ;;  %1240 = vmatprep.subr.mxu1 %v864_v48 }
  0x80   : > { %1206 = vmatpush3.msra.mxu0 %v771_v33  ;;  %1241 = vmatpush3.msra.mxu1 %v864_v48 }
  0x81   : > { %1207 = vmatprep.subr.mxu0 %v770_v34  ;;  %1242 = vmatprep.subr.mxu1 %v863_v49 }
  0x82   : > { %1208 = vmatpush3.msra.mxu0 %v770_v34  ;;  %1243 = vmatpush3.msra.mxu1 %v863_v49 }
  0x83   : > { %1209 = vmatprep.subr.mxu0 %v769_v36  ;;  %1244 = vmatprep.subr.mxu1 %v862_v50 }
  0x84   : > { %1210 = vmatpush3.msra.mxu0 %v769_v36  ;;  %1245 = vmatpush3.msra.mxu1 %v862_v50 }
  0x85   : > { %1211 = vmatprep.subr.mxu0 %v768_v37  ;;  %1246 = vmatprep.subr.mxu1 %v861_v51 }
  0x86   : > { %1212 = vmatpush3.msra.mxu0 %v768_v37  ;;  %1247 = vmatpush3.msra.mxu1 %v861_v51 }
  0x87   : > { %1213 = vmatprep.subr.mxu0 %v767_v24  ;;  %1248 = vmatprep.subr.mxu1 %v860_v53 }
  0x88   : > { %1214 = vmatpush3.msra.mxu0 %v767_v24  ;;  %1249 = vmatpush3.msra.mxu1 %v860_v53 }
  0x89   : > { %1215 = vmatprep.subr.mxu0 %v766_v25  ;;  %1250 = vmatprep.subr.mxu1 %v859_v54 }
  0x8a   : > { %1216 = vmatpush3.msra.mxu0 %v766_v25  ;;  %1251 = vmatpush3.msra.mxu1 %v859_v54 }
  0x8b   : > { %1217 = vmatprep.subr.mxu0 %v765_v35  ;;  %1252 = vmatprep.subr.mxu1 %v858_v55 }
  0x8c   : > { %1218 = vmatpush3.msra.mxu0 %v765_v35  ;;  %1253 = vmatpush3.msra.mxu1 %v858_v55 }
  0x8d   : > { %1219 = vmatprep.subr.mxu0 %v764_v41  ;;  %1254 = vmatprep.subr.mxu1 %v857_v14 }
  0x8e   : > { %1220 = vmatpush3.msra.mxu0 %v764_v41  ;;  %1255 = vmatpush3.msra.mxu1 %v857_v14 }
  0x8f   : > { %1221 = vmatprep.subr.mxu0 %v763_v42  ;;  %1256 = vmatprep.subr.mxu1 %v856_v56 }
  0x90   : > { %1222 = vmatpush3.msra.mxu0 %v763_v42  ;;  %1257 = vmatpush3.msra.mxu1 %v856_v56 }
  0x91   : > { %1223 = vmatprep.subr.mxu0 %v762_v43  ;;  %1258 = vmatprep.subr.mxu1 %v855_v57 }
  0x92   : > { %1224 = vmatpush3.msra.mxu0 %v762_v43  ;;  %1259 = vmatpush3.msra.mxu1 %v855_v57 }
  0x93   : > { %1225 = vmatprep.subr.mxu0 %v761_v44  ;;  %1260 = vmatprep.subr.mxu1 %v854_v58 }
  0x94   : > { %1226 = vmatpush3.msra.mxu0 %v761_v44  ;;  %1261 = vmatpush3.msra.mxu1 %v854_v58 }
  0x95   : > { %1227 = vmatprep.subr.mxu0 %v760_v45  ;;  %1262 = vmatprep.subr.mxu1 %v853_v59 }
  0x96   : > { %1228 = vmatpush3.msra.mxu0 %v760_v45  ;;  %1263 = vmatpush3.msra.mxu1 %v853_v59 }
  0x97   : > { %1229 = vmatprep.subr.mxu0 %v759_v39  ;;  %1264 = vmatprep.subr.mxu1 %v852_v8 }
  0x98   : > { %1230 = vmatpush3.msra.mxu0 %v759_v39  ;;  %1265 = vmatpush3.msra.mxu1 %v852_v8 }
  0x99   : > { %1231 = vmatprep.subr.mxu0 %v758_v46  ;;  %1266 = vmatprep.subr.mxu1 %v851_v9 }
  0x9a   : > { %1232 = vmatpush3.msra.mxu0 %v758_v46  ;;  %1267 = vmatpush3.msra.mxu1 %v851_v9 }
  0x9b   : > { %1233 = vmatprep.subr.mxu0 %v757_v38  ;;  %1268 = vmatprep.subr.mxu1 %v850_v10 }
  0x9c   : > { %1234 = vmatpush3.msra.mxu0 %v757_v38  ;;  %1269 = vmatpush3.msra.mxu1 %v850_v10 }
 0x12b   : > { %v1145_v60 = vpop.f32.mrf.mxu0  ;;  %v1164_v61 = vpop.f32.mrf.mxu1 }
 0x12c   : > { %v584_v16 = vmul.f32 %v1164_v61, %v1145_v60 }
 0x12d   : > { %v490_v62 = vpop.f32.mrf.mxu0  ;;  %v574_v63 = vpop.f32.mrf.mxu1 }
 0x12e   : > { %v583_v2 = vmul.f32 %v574_v63, %v490_v62 }
 0x13c   : > { %v1183_v0 = vpop.f32.mrf.mxu0  ;;  %v1202_v1 = vpop.f32.mrf.mxu1 }
 0x13d   : > { %v670_v3 = vmul.f32 %v1183_v0, %v584_v16 }
 0x13e   : > { %v660_v52 = vpop.f32.mrf.mxu0  ;;  %v746_v5 = vpop.f32.mrf.mxu1 }
 0x13f   : > { %v669_v4 = vmul.f32 %v660_v52, %v583_v2  ;;  %v756_v7 = vmul.f32 %v1202_v1, %v670_v3 }
 0x141   : > { %v755_v6 = vmul.f32 %v746_v5, %v669_v4 }
 0x143   : > { %1235 = vmatprep.mubr.f32.mxu0 %v755_v6 }
 0x144   : > { %1236 = vmatmul.mubr.f32.vlgmr.msra.gmra.mxu0 %v756_v7 }
 0x204   : > { %v1237_v12 = vpop.f32.mrf.mxu0 }
 0x205   : > { %v849_v17 = vmul.f32 %v1237_v12, %v1237_v12 }
 0x206   : > { %v839_v13 = vpop.f32.mrf.mxu0 }
 0x207   : > { %v848_v15 = vmul.f32 %v839_v13, %v839_v13 }
 0x209   : > { %1270 = vmatprep.mubr.f32.mxu1 %v848_v15 }
 0x20a   : > { %1271 = vmatmul.mubr.f32.vlgmr.msra.gmra.mxu1 %v849_v17 }
 0x2ca   : > { %v1272_v40 = vpop.f32.mrf.mxu1 }
 0x2cb   : > { %943 = vst.msk [vmem:[%s199_s11 + $0x8] sm:$0xff] %vm941_vm11, %v1272_v40 }
 0x2cc   : > { %v932_v18 = vpop.f32.mrf.mxu1 }
 0x2cd   : > { %942 = vst.msk [vmem:[%s199_s11] sm:$0xff] %vm941_vm11, %v932_v18 }
 0x2ce PF: > { %s14_s15 = sadd.s32 1, %s1309_s15  }
 0x2cf   : > { %p11_p4 = scmp.ge.s32.totalorder %s14_s15, 4  }
 0x2d1   :  { %13 = sbr.rel (!%p11_p4) target bundleno = 1 (0x1), region = 69 }

</bundles_post_ra>
